<compile_context>
chip_gen: v7x
topology: tpu7x:2x2x1
jax: 0.10.0
libtpu: 0.0.40
codegen_flags: <defaults>
</compile_context>

<pallas_src>
import jax
import jax.numpy as jnp
from jax import lax
from jax.experimental import pallas as pl
from jax.experimental.pallas import tpu as pltpu


# ------------------------------ small helpers ------------------------------
def _round_up(x, m):
    return ((x + m - 1) // m) * m


def _pick_row_tile(rows, max_tile):
    """Largest multiple of 16 that divides `rows` and is <= max_tile (rows % 16 == 0)."""
    t = min(rows, max_tile)
    t -= t % 16
    t = max(t, 16)
    while rows % t:
        t -= 16
    return t


# --------------------- stage 1: hoisted input projection --------------------
def _input_proj_kernel(x_ref, w_ref, b_ref, o_ref):
    # One row-tile of gx0 = x @ W_ih0^T + folded bias  (bf16 operands, f32 accumulate)
    o_ref[...] = (
        jnp.dot(x_ref[...], w_ref[...], preferred_element_type=jnp.float32)
        + b_ref[...]
    )


def gru_input_projection(x_rows, w_ih0, bias0):
    """x_rows: (R, E) bf16; w_ih0: (E, 3*Hp) bf16; bias0: (1, 3*Hp) f32 -> (R, 3*Hp) f32."""
    R, E = x_rows.shape
    G3 = w_ih0.shape[1]
    tm = _pick_row_tile(R, 512)
    return pl.pallas_call(
        _input_proj_kernel,
        out_shape=jax.ShapeDtypeStruct((R, G3), jnp.float32),
        grid_spec=pltpu.PrefetchScalarGridSpec(
            num_scalar_prefetch=0,
            grid=(R // tm,),
            in_specs=[
                pl.BlockSpec((tm, E), lambda i: (i, 0)),
                pl.BlockSpec((E, G3), lambda i: (0, 0)),   # resident weight
                pl.BlockSpec((1, G3), lambda i: (0, 0)),   # resident bias
            ],
            out_specs=pl.BlockSpec((tm, G3), lambda i: (i, 0)),
        ),
        compiler_params=pltpu.CompilerParams(
            dimension_semantics=("parallel",)),
    )(x_rows, w_ih0, bias0)


# ------------------------- stage 2: GRU recurrence --------------------------
def _gru_recurrence_kernel(gx_ref, whh0_ref, wih1_ref, whh1_ref,
                           bhh0n_ref, b1_ref, bhh1n_ref,
                           out_ref, h0_ref, h1_ref):
    t = pl.program_id(1)
    hp = out_ref.shape[1]

    @pl.when(t == 0)
    def _init():
        h0_ref[...] = jnp.zeros_like(h0_ref)
        h1_ref[...] = jnp.zeros_like(h1_ref)

    # ---- layer 0 (input projection hoisted; only h-dependent matmul here) ----
    gx = gx_ref[0]                                           # (TN, 3*Hp) f32
    h0 = h0_ref[...]
    gh0 = jnp.dot(h0.astype(jnp.bfloat16), whh0_ref[...],
                  preferred_element_type=jnp.float32)
    r0 = jax.nn.sigmoid(gx[:, 0:hp] + gh0[:, 0:hp])
    z0 = jax.nn.sigmoid(gx[:, hp:2 * hp] + gh0[:, hp:2 * hp])
    n0 = jnp.tanh(gx[:, 2 * hp:] + r0 * (gh0[:, 2 * hp:] + bhh0n_ref[...]))
    h0_new = (1.0 - z0) * n0 + z0 * h0
    h0_ref[...] = h0_new

    # ---- layer 1 ----
    gi1 = jnp.dot(h0_new.astype(jnp.bfloat16), wih1_ref[...],
                  preferred_element_type=jnp.float32) + b1_ref[...]
    h1 = h1_ref[...]
    gh1 = jnp.dot(h1.astype(jnp.bfloat16), whh1_ref[...],
                  preferred_element_type=jnp.float32)
    r1 = jax.nn.sigmoid(gi1[:, 0:hp] + gh1[:, 0:hp])
    z1 = jax.nn.sigmoid(gi1[:, hp:2 * hp] + gh1[:, hp:2 * hp])
    n1 = jnp.tanh(gi1[:, 2 * hp:] + r1 * (gh1[:, 2 * hp:] + bhh1n_ref[...]))
    h1_new = (1.0 - z1) * n1 + z1 * h1
    h1_ref[...] = h1_new

    @pl.when(t == pl.num_programs(1) - 1)
    def _finish():
        out_ref[...] = h1_new


def gru_recurrence(gx0, kp):
    """gx0: (T, N_pad, 3*Hp) f32 streamed per timestep. Returns (N_pad, Hp) f32."""
    T, n_pad, G3 = gx0.shape
    hp = G3 // 3
    tn = _pick_row_tile(n_pad, 256)
    return pl.pallas_call(
        _gru_recurrence_kernel,
        out_shape=jax.ShapeDtypeStruct((n_pad, hp), jnp.float32),
        grid_spec=pltpu.PrefetchScalarGridSpec(
            num_scalar_prefetch=0,
            grid=(n_pad // tn, T),
            in_specs=[
                pl.BlockSpec((1, tn, G3), lambda n, t: (t, n, 0)),  # gx0[t] streamed
                pl.BlockSpec((hp, G3), lambda n, t: (0, 0)),        # W_hh0 resident
                pl.BlockSpec((hp, G3), lambda n, t: (0, 0)),        # W_ih1 resident
                pl.BlockSpec((hp, G3), lambda n, t: (0, 0)),        # W_hh1 resident
                pl.BlockSpec((1, hp), lambda n, t: (0, 0)),         # b_hh0 (n gate)
                pl.BlockSpec((1, G3), lambda n, t: (0, 0)),         # folded layer-1 bias
                pl.BlockSpec((1, hp), lambda n, t: (0, 0)),         # b_hh1 (n gate)
            ],
            out_specs=pl.BlockSpec((tn, hp), lambda n, t: (n, 0)),
            scratch_shapes=[pltpu.VMEM((tn, hp), jnp.float32),      # h0 carry
                            pltpu.VMEM((tn, hp), jnp.float32)],     # h1 carry
        ),
        compiler_params=pltpu.CompilerParams(
            dimension_semantics=("parallel", "arbitrary")),
    )(gx0, kp["whh0"], kp["wih1"], kp["whh1"],
      kp["bhh0_n"], kp["bias1"], kp["bhh1_n"])


# ----------------------------- parameter packing ----------------------------
def _pack_gate_weight(w, in_pad, h_pad):
    """PyTorch gate-stacked (3H, in) weight -> transposed, per-gate lane-padded (in_pad, 3*h_pad) bf16."""
    h3, in_dim = w.shape
    h = h3 // 3
    cols = []
    for g in range(3):
        wg = w[g * h:(g + 1) * h, :].T                              # (in_dim, H)
        wg = jnp.pad(wg, ((0, in_pad - in_dim), (0, h_pad - h)))
        cols.append(wg)
    return jnp.concatenate(cols, axis=1).astype(jnp.bfloat16)       # (in_pad, 3*h_pad)


def _pack_gate_bias(b, h_pad):
    h = b.shape[0] // 3
    parts = [jnp.pad(b[g * h:(g + 1) * h], (0, h_pad - h)) for g in range(3)]
    return jnp.concatenate(parts).reshape(1, 3 * h_pad).astype(jnp.float32)


def make_params(key, hidden_size, embed_size, dict_size):
    """PyTorch-style init (uniform(-1/sqrt(H), 1/sqrt(H))) + prepacked kernel params."""
    H, E = hidden_size, embed_size
    k = 1.0 / jnp.sqrt(jnp.float32(H))
    keys = jax.random.split(key, 10)

    def u(kk, shape):
        return jax.random.uniform(kk, shape, jnp.float32, -k, k)

    embed_table = jax.random.normal(keys[0], (dict_size, E), jnp.float32)

    raw = dict(
        wih0=u(keys[1], (3 * H, E)), whh0=u(keys[2], (3 * H, H)),
        bih0=u(keys[3], (3 * H,)),   bhh0=u(keys[4], (3 * H,)),
        wih1=u(keys[5], (3 * H, H)), whh1=u(keys[6], (3 * H, H)),
        bih1=u(keys[7], (3 * H,)),   bhh1=u(keys[8], (3 * H,)),
    )

    hp = _round_up(H, 128)
    zH = jnp.zeros((H,), jnp.float32)
    # r,z gates: b_ih + b_hh can be folded (they are summed pre-activation);
    # n gate: only b_ih folds, b_hh_n must stay inside r * (W_hn h + b_hn).
    b0_fold = raw["bih0"] + jnp.concatenate([raw["bhh0"][:2 * H], zH])
    b1_fold = raw["bih1"] + jnp.concatenate([raw["bhh1"][:2 * H], zH])

    kern = dict(
        wih0=_pack_gate_weight(raw["wih0"], E, hp),                 # (E, 3Hp) bf16
        bias0=_pack_gate_bias(b0_fold, hp),                         # (1, 3Hp) f32
        whh0=_pack_gate_weight(raw["whh0"], hp, hp),                # (Hp, 3Hp) bf16
        bhh0_n=jnp.pad(raw["bhh0"][2 * H:], (0, hp - H)).reshape(1, hp),
        wih1=_pack_gate_weight(raw["wih1"], hp, hp),
        bias1=_pack_gate_bias(b1_fold, hp),
        whh1=_pack_gate_weight(raw["whh1"], hp, hp),
        bhh1_n=jnp.pad(raw["bhh1"][2 * H:], (0, hp - H)).reshape(1, hp),
    )

    return {"embed": embed_table, "raw": raw, "kernel": kern}


# ------------------------------ full forward --------------------------------
def gru_encoder_forward(params, ques_ids, qs):
    """GRUencoder.forward: embed ques, run the shared 2-layer GRU over all 7 sequences,
    take out[:, -1, :] of each, concat -> (B, 7*H)."""
    B, T = ques_ids.shape
    embed = params["embed"]
    E = embed.shape[1]
    H = params["raw"]["whh0"].shape[1]
    hp = params["kernel"]["whh0"].shape[0]

    ques_emb = jnp.take(embed, ques_ids, axis=0)                    # (B, T, E) glue
    stacked = jnp.stack([ques_emb] + list(qs), axis=0)              # (7, B, T, E)
    N = 7 * B
    x = stacked.reshape(N, T, E)

    n_pad = _round_up(N, 16)                                        # bf16 sublane pack
    if n_pad != N:
        x = jnp.pad(x, ((0, n_pad - N), (0, 0), (0, 0)))

    # Time-major layout so the recurrence streams one (n_pad, 3Hp) slab per timestep.
    x_t = x.transpose(1, 0, 2).astype(jnp.bfloat16)                 # (T, n_pad, E)

    kp = params["kernel"]
    gx0 = gru_input_projection(x_t.reshape(T * n_pad, E), kp["wih0"], kp["bias0"])
    gx0 = gx0.reshape(T, n_pad, 3 * hp)

    h_last = gru_recurrence(gx0, kp)                                # (n_pad, Hp)
    h_last = h_last[:N, :H]                                         # drop row/lane padding
    return h_last.reshape(7, B, H).transpose(1, 0, 2).reshape(B, 7 * H)


# ---------------- pure-JAX f32 reference (PyTorch GRU semantics) -------------
def _ref_gru2_last_hidden(x_nte, raw, H):
    def cell(x_t, h, wih, whh, bih, bhh):
        gx = x_t @ wih.T + bih
        gh = h @ whh.T + bhh
        r = jax.nn.sigmoid(gx[:, :H] + gh[:, :H])
        z = jax.nn.sigmoid(gx[:, H:2 * H] + gh[:, H:2 * H])
        n = jnp.tanh(gx[:, 2 * H:] + r * gh[:, 2 * H:])
        return (1.0 - z) * n + z * h

    N = x_nte.shape[0]
    x_tne = jnp.transpose(x_nte, (1, 0, 2))

    def step(carry, x_t):
        h0, h1 = carry
        h0 = cell(x_t, h0, raw["wih0"], raw["whh0"], raw["bih0"], raw["bhh0"])
        h1 = cell(h0, h1, raw["wih1"], raw["whh1"], raw["bih1"], raw["bhh1"])
        return (h0, h1), None

    init = (jnp.zeros((N, H), jnp.float32), jnp.zeros((N, H), jnp.float32))
    (_, h1), _ = lax.scan(step, init, x_tne)
    return h1


if __name__ == "__main__":
    hidden_size = 32
    embed_size = 32
    dict_size = 50
    batch = 2
    seq = 8

    key = jax.random.PRNGKey(0)
    kparam, kq, *kqs = jax.random.split(key, 9)

    params = make_params(kparam, hidden_size, embed_size, dict_size)

    ques_ids = jax.random.randint(kq, (batch, seq), 0, dict_size, dtype=jnp.int32)
    qs = [jax.random.normal(kk, (batch, seq, embed_size), jnp.float32) for kk in kqs[:6]]

    out = gru_encoder_forward(params, ques_ids, qs)
    out = jax.block_until_ready(out)
    assert out.shape == (batch, 7 * hidden_size), out.shape

    # Verify against a pure-JAX f32 reference of the PyTorch GRU math
    # (kernel uses bf16 matmul operands with f32 accumulation -> relaxed tolerance).
    ques_emb = jnp.take(params["embed"], ques_ids, axis=0)
    stacked = jnp.stack([ques_emb] + qs, axis=0).reshape(7 * batch, seq, embed_size)
    ref = _ref_gru2_last_hidden(stacked, params["raw"], hidden_size)
    ref = ref.reshape(7, batch, hidden_size).transpose(1, 0, 2).reshape(batch, 7 * hidden_size)
    max_err = float(jnp.max(jnp.abs(out - ref)))
    assert jnp.allclose(out, ref, atol=3e-2, rtol=3e-2), max_err

    print("KERNEL_OK")
</pallas_src>

<mosaic_0001>
module attributes {stable_mosaic.version = 11 : i64} {
  func.func @_input_proj_kernel(%arg0: i32, %arg1: memref<128x32xbf16, #tpu.memory_space<vmem>>, %arg2: memref<32x384xbf16, #tpu.memory_space<vmem>>, %arg3: memref<1x384xf32, #tpu.memory_space<vmem>>, %arg4: memref<128x384xf32, #tpu.memory_space<vmem>>) attributes {dimension_semantics = [#tpu.dimension_semantics<parallel>], iteration_bounds = array<i64: 1>, scalar_prefetch = 0 : i64, scratch_operands = 0 : i64, tpu.core_type = #tpu.core_type<tc>, window_params = [{transform_indices = @transform_0, window_bounds = array<i64: 128, 32>}, {pipeline_mode = #tpu.pipeline_mode<synchronous>, transform_indices = @transform_1, window_bounds = array<i64: 32, 384>}, {pipeline_mode = #tpu.pipeline_mode<synchronous>, transform_indices = @transform_2, window_bounds = array<i64: 1, 384>}, {transform_indices = @transform_3, window_bounds = array<i64: 128, 384>}]} {
    %c0 = arith.constant 0 : index
    %c0_0 = arith.constant 0 : index
    %0 = vector.load %arg1[%c0, %c0_0] : memref<128x32xbf16, #tpu.memory_space<vmem>>, vector<128x32xbf16>
    %c0_1 = arith.constant 0 : index
    %c0_2 = arith.constant 0 : index
    %1 = vector.load %arg2[%c0_1, %c0_2] : memref<32x384xbf16, #tpu.memory_space<vmem>>, vector<32x384xbf16>
    %cst = arith.constant dense<0.000000e+00> : vector<128x384xf32>
    %2 = tpu.matmul %0, %1, %cst {dimension_numbers = #tpu.dot_dimension_numbers<[1], [0], [0], [1], [0, 0, 1, 1], [], []>} : vector<128x32xbf16>, vector<32x384xbf16>, vector<128x384xf32> -> vector<128x384xf32>
    %c0_3 = arith.constant 0 : index
    %c0_4 = arith.constant 0 : index
    %3 = vector.load %arg3[%c0_3, %c0_4] : memref<1x384xf32, #tpu.memory_space<vmem>>, vector<1x384xf32>
    %4 = vector.broadcast %3 : vector<1x384xf32> to vector<128x384xf32>
    %5 = arith.addf %2, %4 : vector<128x384xf32>
    %c0_5 = arith.constant 0 : index
    %c0_6 = arith.constant 0 : index
    %6 = vector.load %arg4[%c0_5, %c0_6] : memref<128x384xf32, #tpu.memory_space<vmem>>, vector<128x384xf32>
    tpu.vector_store %arg4[%c0_5, %c0_6], %5 {strides = array<i32>} : memref<128x384xf32, #tpu.memory_space<vmem>>, vector<128x384xf32>,
    return
  }
  func.func @transform_0(%arg0: i32) -> (i32, i32) {
    %c0_i32 = arith.constant 0 : i32
    %c0_i32_0 = arith.constant 0 : i32
    return %arg0, %c0_i32 : i32, i32
  }
  func.func @transform_1(%arg0: i32) -> (i32, i32) {
    %c0_i32 = arith.constant 0 : i32
    %c0_i32_0 = arith.constant 0 : i32
    %c0_i32_1 = arith.constant 0 : i32
    return %c0_i32, %c0_i32_0 : i32, i32
  }
  func.func @transform_2(%arg0: i32) -> (i32, i32) {
    %c0_i32 = arith.constant 0 : i32
    %c0_i32_0 = arith.constant 0 : i32
    %c0_i32_1 = arith.constant 0 : i32
    return %c0_i32, %c0_i32_0 : i32, i32
  }
  func.func @transform_3(%arg0: i32) -> (i32, i32) {
    %c0_i32 = arith.constant 0 : i32
    %c0_i32_0 = arith.constant 0 : i32
    return %arg0, %c0_i32 : i32, i32
  }
}

</mosaic_0001>

<bundles_post_ra>
// kernel: tpu_custom_call.1
= control target key start
LH: loop header
LB: loop body
LE: loop exit
PB: predicated region body
PF: predicated region fallthrough
CT: control target
= control target key end

     0   :  { %v536_v2 = vmov 0   ;;  %vm129_vm0 = vcmask 261120   ;;  %s687_s0 = inlined_call_operand.vmem [shape: bf16[128,32], index: 0, kind: input, shape index: {}]   ;;  %s688_s1 = inlined_call_operand.vmem [shape: bf16[32,384], index: 1, kind: input, shape index: {}]   ;;  %s689_s2 = inlined_call_operand.vmem [shape: f32[1,384], index: 2, kind: input, shape index: {}]   ;;  %s690_s3 = inlined_call_operand.hbm [shape: f32[128,384], index: 3, kind: output, shape index: {}]  }
   0x1   :  { %v496_v0 = vld [vmem:[%s688_s1 + $0x4] ss:$12 sps:$4 sm:$0xff]   ;;  %v498_v1 = vld [vmem:[%s688_s1] ss:$12 sps:$4 sm:$0xff]   ;;  %186 = vmatprep.mubr.bf16.mxu0 %v536_v2  ;;  %246 = vmatprep.mubr.bf16.mxu1 %v536_v2  ;;  %v499_v3 = vld [vmem:[%s688_s1 + $0x1c] ss:$12 sps:$4 sm:$0xff]  }
   0x2   :  { %154 = vmatprep.subr.bf16.mxu0 %v496_v0  ;;  %488 = vmatprep.subr.bf16.mxu1 %v496_v0  ;;  %v501_v4 = vld [vmem:[%s688_s1 + $0x18] ss:$12 sps:$4 sm:$0xff]   ;;  %v504_v6 = vld [vmem:[%s688_s1 + $0x8] ss:$12 sps:$4 sm:$0xff]   ;;  %v507_v8 = vld [vmem:[%s688_s1 + $0x20] ss:$12 sps:$4 sm:$0xff]  }
   0x3   :  { %155 = vmatpush1.bf16.msra.mxu0 %v498_v1  ;;  %490 = vmatpush1.bf16.msra.mxu1 %v498_v1  ;;  %v502_v5 = vld [vmem:[%s687_s0] sm:$0xff]   ;;  %v503_v7 = vld [vmem:[%s687_s0 + $0x30] sm:$0xff]  }
   0x4   :  { %156 = vmatprep.subr.bf16.mxu0 %v499_v3  ;;  %489 = vmatprep.subr.bf16.mxu1 %v499_v3 }
   0x7   :  { %157 = vmatpush1.bf16.msra.mxu0 %v501_v4  ;;  %491 = vmatpush1.bf16.msra.mxu1 %v501_v4 }
   0x8   :  { %468 = vmatprep.subr.bf16.mxu1 %v504_v6 }
   0xa   :  { %442 = vmatmul.mubr.msk.bf16.vlgmr.msra.gmra.mrb[0].mxu0 %vm129_vm0, %v502_v5  ;;  %448 = vmatmul.mubr.msk.bf16.vlgmr.msra.gmra.mrb[0].mxu1 %vm129_vm0, %v503_v7 }
   0xb   :  { %469 = vmatpush3.bf16.msra.mxu1 %v504_v6  ;;  %196 = vmatprep.mubr.bf16.mxu0 %v536_v2 }
   0xc   :  { %256 = vmatprep.mubr.bf16.mxu1 %v536_v2  ;;  %470 = vmatprep.subr.bf16.mxu1 %v507_v8 }
   0xd   :  { %8 = vsyncpa [#allocation3], 0  ;;  %v505_v9 = vld [vmem:[%s687_s0 + $0x8] sm:$0xff]   ;;  %v506_v10 = vld [vmem:[%s687_s0 + $0x38] sm:$0xff]   ;;  %v42_v15 = vlaneseq }
   0xe   :  { %v508_v11 = vld [vmem:[%s687_s0 + $0x10] sm:$0xff]   ;;  %v509_v12 = vld [vmem:[%s687_s0 + $0x18] sm:$0xff]   ;;  %v510_v13 = vld [vmem:[%s687_s0 + $0x20] sm:$0xff]  }
   0xf   :  { %471 = vmatpush3.bf16.msra.mxu1 %v507_v8  ;;  %v511_v14 = vld [vmem:[%s687_s0 + $0x28] sm:$0xff]   ;;  %v43_v16 = vshrl.u32 %v42_v15, 7  ;;  %v40_v18 = vld [vmem:[%s689_s2] sm:$0x7]  ;;  %s537_s0 = smov [#allocation2]  }
  0x10   :  { %s417_s2 = sshll.u32 %s537_s0, 4  ;;  %s418_s2 = int_to_ptr.vmem [resolvable:$true] %s417_s2 }
  0x11   :  { %v44_v17 = vsub.s32 0, %v43_v16  ;;  %v48_v19 = vsub.s32 1, %v43_v16  ;;  %v52_v44 = vsub.s32 2, %v43_v16  ;;  %s512_s14 = scalar_lea.vmem %s418_s2, 6144  ;;  %p517_p1 = scmp.lt.s32.totalorder %s418_s2, %s418_s2 }
  0x12   :  { %443 = vmatmul.mubr.msk.bf16.gmra.mrb[4].mxu0 %vm129_vm0, %v505_v9  ;;  %449 = vmatmul.mubr.msk.bf16.gmra.mrb[4].mxu1 %vm129_vm0, %v506_v10  ;;  %p513_p0 = scmp.ne.s32.totalorder %s418_s2, %s512_s14  ;;  %p518_p2 = scmp.lt.s32.totalorder %s512_s14, %s512_s14 }
  0x13   :  { %206 = vmatprep.mubr.bf16.mxu0 %v536_v2  ;;  %472 = vmatprep.mubr.msk.bf16.mxu1 %vm129_vm0, %v502_v5  ;;  %v621_v20 = vrot.slane %v40_v18, %v44_v17  ;;  %v623_v21 = vrot.slane %v40_v18, %v48_v19  ;;  %v641_v55 = vrot.slane %v40_v18, %v52_v44 }
  0x14   :  { %p519_p3 = por %p518_p2, %p517_p1 }
  0x16   :  { %p520_p4 = pnand %p519_p3, %p513_p0 }
  0x1a   :  { %444 = vmatmul.mubr.msk.bf16.gmra.mrb[8].mxu0 %vm129_vm0, %v508_v11  ;;  %473 = vmatmul.mubr.msk.bf16.vlgmr.msra.gmra.mrb[8].mxu1 %vm129_vm0, %v505_v9 }
  0x1b   :  { %216 = vmatprep.mubr.bf16.mxu0 %v536_v2  ;;  %476 = vmatprep.mubr.msk.bf16.mxu1 %vm129_vm0, %v508_v11 }
  0x22   :  { %445 = vmatmul.mubr.msk.bf16.gmra.mrb[12].mxu0 %vm129_vm0, %v509_v12  ;;  %477 = vmatmul.mubr.msk.bf16.gmra.mrb[12].mxu1 %vm129_vm0, %v509_v12 }
  0x23   :  { %226 = vmatprep.mubr.bf16.mxu0 %v536_v2  ;;  %480 = vmatprep.mubr.msk.bf16.mxu1 %vm129_vm0, %v510_v13 }
  0x2a   :  { %446 = vmatmul.mubr.msk.bf16.gmra.mrb[16].mxu0 %vm129_vm0, %v510_v13  ;;  %481 = vmatmul.mubr.msk.bf16.gmra.mrb[16].mxu1 %vm129_vm0, %v511_v14 }
  0x2b   :  { %236 = vmatprep.mubr.bf16.mxu0 %v536_v2  ;;  %484 = vmatprep.mubr.msk.bf16.mxu1 %vm129_vm0, %v503_v7 }
  0x32   :  { %447 = vmatmul.mubr.msk.bf16.gmra.mrb[20].mxu0 %vm129_vm0, %v511_v14  ;;  %485 = vmatmul.mubr.msk.bf16.gmra.mrb[20].mxu1 %vm129_vm0, %v506_v10 }
  0xdd   :  { %v188_v22 = vpop.f32.mrb[0].mxu0  ;;  %v248_v23 = vpop.f32.mrb[0].mxu1 }
  0xde   :  { %v189_v24 = vadd.f32 %v188_v22, %v621_v20  ;;  %v249_v25 = vadd.f32 %v248_v23, %v621_v20  ;;  %v190_v26 = vpop.f32.mrb[1].mxu0  ;;  %v250_v27 = vpop.f32.mrb[1].mxu1 }
  0xdf   :  { %v191_v28 = vadd.f32 %v190_v26, %v623_v21  ;;  %v251_v29 = vadd.f32 %v250_v27, %v623_v21  ;;  %v192_v30 = vpop.f32.mrb[2].mxu0  ;;  %v252_v31 = vpop.f32.mrb[2].mxu1 }
  0xe0   :  { %364 = vst [vmem:[#allocation2] sm:$0xff] %v189_v24  ;;  %400 = vst [vmem:[#allocation2 + $0x120] sm:$0xff] %v249_v25  ;;  %v193_v32 = vadd.f32 %v192_v30, %v621_v20  ;;  %v253_v33 = vadd.f32 %v252_v31, %v621_v20  ;;  %v194_v34 = vpop.f32.mrb[3].mxu0  ;;  %v254_v35 = vpop.f32.mrb[3].mxu1 }
  0xe1   :  { %365 = vst [vmem:[#allocation2 + $0x8] sm:$0xff] %v191_v28  ;;  %401 = vst [vmem:[#allocation2 + $0x128] sm:$0xff] %v251_v29  ;;  %v195_v36 = vadd.f32 %v194_v34, %v623_v21  ;;  %v255_v37 = vadd.f32 %v254_v35, %v623_v21 }
  0xe2   :  { %367 = vst [vmem:[#allocation2 + $0x18] sm:$0xff] %v193_v32  ;;  %403 = vst [vmem:[#allocation2 + $0x138] sm:$0xff] %v253_v33 }
  0xe3   :  { %368 = vst [vmem:[#allocation2 + $0x20] sm:$0xff] %v195_v36  ;;  %404 = vst [vmem:[#allocation2 + $0x140] sm:$0xff] %v255_v37 }
  0xe5   :  { %v198_v38 = vpop.f32.mrb[4].mxu0  ;;  %v258_v39 = vpop.f32.mrb[4].mxu1 }
  0xe6   :  { %v199_v40 = vadd.f32 %v198_v38, %v621_v20  ;;  %v259_v41 = vadd.f32 %v258_v39, %v621_v20  ;;  %v200_v42 = vpop.f32.mrb[5].mxu0  ;;  %v260_v43 = vpop.f32.mrb[5].mxu1 }
  0xe7   :  { %v201_v45 = vadd.f32 %v200_v42, %v623_v21  ;;  %v261_v46 = vadd.f32 %v260_v43, %v623_v21  ;;  %v202_v47 = vpop.f32.mrb[6].mxu0  ;;  %v262_v48 = vpop.f32.mrb[6].mxu1 }
  0xe8   :  { %370 = vst [vmem:[#allocation2 + $0x30] sm:$0xff] %v199_v40  ;;  %406 = vst [vmem:[#allocation2 + $0x150] sm:$0xff] %v259_v41  ;;  %v203_v49 = vadd.f32 %v202_v47, %v621_v20  ;;  %v263_v50 = vadd.f32 %v262_v48, %v621_v20  ;;  %v204_v51 = vpop.f32.mrb[7].mxu0  ;;  %v264_v52 = vpop.f32.mrb[7].mxu1 }
  0xe9   :  { %371 = vst [vmem:[#allocation2 + $0x38] sm:$0xff] %v201_v45  ;;  %407 = vst [vmem:[#allocation2 + $0x158] sm:$0xff] %v261_v46  ;;  %v205_v53 = vadd.f32 %v204_v51, %v623_v21  ;;  %v265_v54 = vadd.f32 %v264_v52, %v623_v21 }
  0xea   :  { %373 = vst [vmem:[#allocation2 + $0x48] sm:$0xff] %v203_v49  ;;  %409 = vst [vmem:[#allocation2 + $0x168] sm:$0xff] %v263_v50 }
  0xeb   :  { %374 = vst [vmem:[#allocation2 + $0x50] sm:$0xff] %v205_v53  ;;  %410 = vst [vmem:[#allocation2 + $0x170] sm:$0xff] %v265_v54 }
  0xed   :  { %v208_v56 = vpop.f32.mrb[8].mxu0  ;;  %v474_v57 = vpop.f32.mrb[8].mxu1 }
  0xee   :  { %v209_v58 = vadd.f32 %v208_v56, %v621_v20  ;;  %v310_v59 = vadd.f32 %v474_v57, %v641_v55  ;;  %v210_v60 = vpop.f32.mrb[9].mxu0  ;;  %v301_v61 = vpop.f32.mrb[9].mxu1 }
  0xef   :  { %v211_v62 = vadd.f32 %v210_v60, %v623_v21  ;;  %v302_v63 = vadd.f32 %v301_v61, %v641_v55  ;;  %v212_v0 = vpop.f32.mrb[10].mxu0  ;;  %v475_v1 = vpop.f32.mrb[10].mxu1 }
  0xf0   :  { %376 = vst [vmem:[#allocation2 + $0x60] sm:$0xff] %v209_v58  ;;  %372 = vst [vmem:[#allocation2 + $0x40] sm:$0xff] %v310_v59  ;;  %v213_v2 = vadd.f32 %v212_v0, %v621_v20  ;;  %v313_v3 = vadd.f32 %v475_v1, %v641_v55  ;;  %v214_v4 = vpop.f32.mrb[11].mxu0  ;;  %v304_v5 = vpop.f32.mrb[11].mxu1 }
  0xf1   :  { %377 = vst [vmem:[#allocation2 + $0x68] sm:$0xff] %v211_v62  ;;  %366 = vst [vmem:[#allocation2 + $0x10] sm:$0xff] %v302_v63  ;;  %v215_v6 = vadd.f32 %v214_v4, %v623_v21  ;;  %v305_v7 = vadd.f32 %v304_v5, %v641_v55 }
  0xf2   :  { %379 = vst [vmem:[#allocation2 + $0x78] sm:$0xff] %v213_v2  ;;  %375 = vst [vmem:[#allocation2 + $0x58] sm:$0xff] %v313_v3 }
  0xf3   :  { %380 = vst [vmem:[#allocation2 + $0x80] sm:$0xff] %v215_v6  ;;  %369 = vst [vmem:[#allocation2 + $0x28] sm:$0xff] %v305_v7 }
  0xf5   :  { %v218_v8 = vpop.f32.mrb[12].mxu0  ;;  %v478_v9 = vpop.f32.mrb[12].mxu1 }
  0xf6   :  { %v219_v10 = vadd.f32 %v218_v8, %v621_v20  ;;  %v326_v11 = vadd.f32 %v478_v9, %v641_v55  ;;  %v220_v12 = vpop.f32.mrb[13].mxu0  ;;  %v317_v13 = vpop.f32.mrb[13].mxu1 }
  0xf7   :  { %v221_v14 = vadd.f32 %v220_v12, %v623_v21  ;;  %v318_v15 = vadd.f32 %v317_v13, %v641_v55  ;;  %v222_v16 = vpop.f32.mrb[14].mxu0  ;;  %v479_v17 = vpop.f32.mrb[14].mxu1 }
  0xf8   :  { %382 = vst [vmem:[#allocation2 + $0x90] sm:$0xff] %v219_v10  ;;  %384 = vst [vmem:[#allocation2 + $0xa0] sm:$0xff] %v326_v11  ;;  %v223_v18 = vadd.f32 %v222_v16, %v621_v20  ;;  %v329_v19 = vadd.f32 %v479_v17, %v641_v55  ;;  %v224_v22 = vpop.f32.mrb[15].mxu0  ;;  %v320_v23 = vpop.f32.mrb[15].mxu1 }
  0xf9   :  { %383 = vst [vmem:[#allocation2 + $0x98] sm:$0xff] %v221_v14  ;;  %378 = vst [vmem:[#allocation2 + $0x70] sm:$0xff] %v318_v15  ;;  %v225_v24 = vadd.f32 %v224_v22, %v623_v21  ;;  %v321_v25 = vadd.f32 %v320_v23, %v641_v55 }
  0xfa   :  { %385 = vst [vmem:[#allocation2 + $0xa8] sm:$0xff] %v223_v18  ;;  %387 = vst [vmem:[#allocation2 + $0xb8] sm:$0xff] %v329_v19 }
  0xfb   :  { %386 = vst [vmem:[#allocation2 + $0xb0] sm:$0xff] %v225_v24  ;;  %381 = vst [vmem:[#allocation2 + $0x88] sm:$0xff] %v321_v25 }
  0xfd   :  { %v228_v26 = vpop.f32.mrb[16].mxu0  ;;  %v482_v27 = vpop.f32.mrb[16].mxu1 }
  0xfe   :  { %v229_v28 = vadd.f32 %v228_v26, %v621_v20  ;;  %v342_v29 = vadd.f32 %v482_v27, %v641_v55  ;;  %v230_v30 = vpop.f32.mrb[17].mxu0  ;;  %v333_v31 = vpop.f32.mrb[17].mxu1 }
  0xff   :  { %v231_v32 = vadd.f32 %v230_v30, %v623_v21  ;;  %v334_v33 = vadd.f32 %v333_v31, %v641_v55  ;;  %v232_v34 = vpop.f32.mrb[18].mxu0  ;;  %v483_v35 = vpop.f32.mrb[18].mxu1 }
 0x100   :  { %388 = vst [vmem:[#allocation2 + $0xc0] sm:$0xff] %v229_v28  ;;  %396 = vst [vmem:[#allocation2 + $0x100] sm:$0xff] %v342_v29  ;;  %v233_v36 = vadd.f32 %v232_v34, %v621_v20  ;;  %v345_v37 = vadd.f32 %v483_v35, %v641_v55  ;;  %v234_v38 = vpop.f32.mrb[19].mxu0  ;;  %v336_v39 = vpop.f32.mrb[19].mxu1 }
 0x101   :  { %389 = vst [vmem:[#allocation2 + $0xc8] sm:$0xff] %v231_v32  ;;  %390 = vst [vmem:[#allocation2 + $0xd0] sm:$0xff] %v334_v33  ;;  %v235_v40 = vadd.f32 %v234_v38, %v623_v21  ;;  %v337_v41 = vadd.f32 %v336_v39, %v641_v55 }
 0x102   :  { %391 = vst [vmem:[#allocation2 + $0xd8] sm:$0xff] %v233_v36  ;;  %399 = vst [vmem:[#allocation2 + $0x118] sm:$0xff] %v345_v37 }
 0x103   :  { %392 = vst [vmem:[#allocation2 + $0xe0] sm:$0xff] %v235_v40  ;;  %393 = vst [vmem:[#allocation2 + $0xe8] sm:$0xff] %v337_v41 }
 0x105   :  { %v238_v42 = vpop.f32.mrb[20].mxu0  ;;  %v486_v43 = vpop.f32.mrb[20].mxu1 }
 0x106   :  { %v239_v44 = vadd.f32 %v238_v42, %v621_v20  ;;  %v358_v45 = vadd.f32 %v486_v43, %v641_v55  ;;  %v240_v46 = vpop.f32.mrb[21].mxu0  ;;  %v349_v47 = vpop.f32.mrb[21].mxu1 }
 0x107   :  { %v241_v48 = vadd.f32 %v240_v46, %v623_v21  ;;  %v350_v49 = vadd.f32 %v349_v47, %v641_v55  ;;  %v242_v50 = vpop.f32.mrb[22].mxu0  ;;  %v487_v51 = vpop.f32.mrb[22].mxu1 }
 0x108   :  { %394 = vst [vmem:[#allocation2 + $0xf0] sm:$0xff] %v239_v44  ;;  %408 = vst [vmem:[#allocation2 + $0x160] sm:$0xff] %v358_v45  ;;  %v243_v52 = vadd.f32 %v242_v50, %v621_v20  ;;  %v361_v53 = vadd.f32 %v487_v51, %v641_v55  ;;  %v244_v54 = vpop.f32.mrb[23].mxu0  ;;  %v352_v56 = vpop.f32.mrb[23].mxu1 }
 0x109   :  { %395 = vst [vmem:[#allocation2 + $0xf8] sm:$0xff] %v241_v48  ;;  %402 = vst [vmem:[#allocation2 + $0x130] sm:$0xff] %v350_v49  ;;  %v245_v57 = vadd.f32 %v244_v54, %v623_v21  ;;  %v353_v58 = vadd.f32 %v352_v56, %v641_v55 }
 0x10a   :  { %397 = vst [vmem:[#allocation2 + $0x108] sm:$0xff] %v243_v52  ;;  %411 = vst [vmem:[#allocation2 + $0x178] sm:$0xff] %v361_v53 }
 0x10b   :  { %398 = vst [vmem:[#allocation2 + $0x110] sm:$0xff] %v245_v57  ;;  %405 = vst [vmem:[#allocation2 + $0x148] sm:$0xff] %v353_v58 }
 0x10c   :  { %523 = shalt.err (!%p520_p4)
}
 0x10d   :  { %s524_s17 = scalar_lea.hbm %s690_s3, 6144 }
 0x10e   :  { %p525_p5 = scmp.ne.s32.totalorder %s690_s3, %s524_s17  ;;  %p528_p6 = scmp.lt.u32.totalorder %s524_s17, %s690_s3 }
 0x110   :  { %p530_p7 = pnand %p528_p6, %p525_p5 }
 0x112   :  { %533 = shalt.err (!%p530_p7)
}
 0x113   :  { %s538_s22 = smov 384   ;;  %s539_s23 = smov 24  }
 0x114   :  { %423 = dma.vmem_to_hbm [thread:$0]  %s418_s2, 6144, %s690_s3, [#allocation3], %s538_s22, %s538_s22, %s539_s23  }
 0x115   :  { %534 = dma.done.wait [#allocation3], 6144  }
 0x116   :  { %535 = vsyncadd [#allocation3], 4294961152 }
 0x117   :  { %427 = vsyncpa [#allocation3], 1 }

</bundles_post_ra>
